<compile_context>
chip_gen: v7x
topology: tpu7x:2x2x1
jax: 0.10.0
libtpu: 0.0.40
codegen_flags: <defaults>
</compile_context>

<pallas_src>
import functools

import jax
import jax.numpy as jnp
from jax.experimental import pallas as pl
from jax.experimental.pallas import tpu as pltpu

IN_SIZE = 12                   # GRU input size (len(x) + out_size)
OUT_SIZE = 4
HIDDEN = 40
RAW_X = IN_SIZE - OUT_SIZE     # length of the raw observation vector
LANES = 128                    # one vreg lane group
BIAS_LANE = HIDDEN + IN_SIZE   # lane of the constant 1.0 in the packed input row


# ---------------------------------------------------------------------------
# Kernel: one GRU step + linear + softmax per grid iteration (grid = timesteps)
# ---------------------------------------------------------------------------
def _drl_actor_kernel(x_ref, h0_ref, wgru_ref, wlin_ref,
                      h_out_ref, p_out_ref, h_sc):
    L = LANES

    @pl.when(pl.program_id(0) == 0)
    def _():
        h_sc[...] = h0_ref[...]          # lane-padded h0 (zeros outside 0:HIDDEN)

    h = h_sc[...]                        # (1, L), zeros in lanes HIDDEN:L
    # Packed input row: lanes 0:HIDDEN are zero, lanes HIDDEN:HIDDEN+IN_SIZE hold
    # [x, pi_b], lane BIAS_LANE holds 1.0.  h and x occupy disjoint lanes.
    u = x_ref[...] + h                   # (1, L)

    # Single fused gate projection: [pre_r | pre_z | gi_n | gh_n], biases folded.
    g = jnp.dot(u, wgru_ref[...], preferred_element_type=jnp.float32)  # (1, 4L)
    r = jax.nn.sigmoid(g[:, 0:L])        # vreg-aligned slices (lane 0/128/256/384)
    z = jax.nn.sigmoid(g[:, L:2 * L])
    n = jnp.tanh(g[:, 2 * L:3 * L] + r * g[:, 3 * L:4 * L])
    h_new = (1.0 - z) * n + z * h        # padding lanes stay exactly 0

    h_sc[...] = h_new
    h_out_ref[...] = h_new

    # Linear(ReLU(h_new)) with the bias folded via a constant-1 lane, then softmax.
    lane = jax.lax.broadcasted_iota(jnp.int32, (1, L), 1)
    a = jnp.maximum(h_new, 0.0)
    a = jnp.where(lane == L - 1, 1.0, a)               # bias row selector
    logits = jnp.dot(a, wlin_ref[...], preferred_element_type=jnp.float32)  # (1, L)
    logits = jnp.where(lane < OUT_SIZE, logits, -1e30)  # mask padding lanes
    m = jnp.max(logits, axis=-1, keepdims=True)
    e = jnp.exp(logits - m)
    p_out_ref[...] = e / jnp.sum(e, axis=-1, keepdims=True)


@functools.lru_cache(maxsize=None)
def _build_call(num_steps: int):
    grid_spec = pltpu.PrefetchScalarGridSpec(
        num_scalar_prefetch=0,
        grid=(num_steps,),
        in_specs=[
            pl.BlockSpec((None, 1, LANES), lambda t: (t, 0, 0)),       # packed x rows
            pl.BlockSpec((1, LANES), lambda t: (0, 0)),                # h0 (lane-padded)
            pl.BlockSpec((LANES, 4 * LANES), lambda t: (0, 0)),        # fused GRU weight
            pl.BlockSpec((LANES, LANES), lambda t: (0, 0)),            # fused linear weight
        ],
        out_specs=[
            pl.BlockSpec((None, 1, LANES), lambda t: (t, 0, 0)),       # hidden states
            pl.BlockSpec((None, 1, LANES), lambda t: (t, 0, 0)),       # action probs
        ],
        scratch_shapes=[pltpu.VMEM((1, LANES), jnp.float32)],          # recurrent h
    )
    return pl.pallas_call(
        _drl_actor_kernel,
        out_shape=(
            jax.ShapeDtypeStruct((num_steps, 1, LANES), jnp.float32),
            jax.ShapeDtypeStruct((num_steps, 1, LANES), jnp.float32),
        ),
        grid_spec=grid_spec,
        compiler_params=pltpu.CompilerParams(
            dimension_semantics=("arbitrary",)),   # sequential recurrence over steps
    )


# ---------------------------------------------------------------------------
# Parameter handling
# ---------------------------------------------------------------------------
def init_params(key):
    """PyTorch-style uniform(-1/sqrt(H), 1/sqrt(H)) init of the raw module params."""
    ks = jax.random.split(key, 6)
    bound = 1.0 / jnp.sqrt(jnp.float32(HIDDEN))
    u = lambda k, shape: jax.random.uniform(k, shape, jnp.float32, -bound, bound)
    return {
        "w_ih": u(ks[0], (3 * HIDDEN, IN_SIZE)),    # GRU weight_ih_l0 (r,z,n)
        "w_hh": u(ks[1], (3 * HIDDEN, HIDDEN)),     # GRU weight_hh_l0 (r,z,n)
        "b_ih": u(ks[2], (3 * HIDDEN,)),            # GRU bias_ih_l0
        "b_hh": u(ks[3], (3 * HIDDEN,)),            # GRU bias_hh_l0
        "w_lin": u(ks[4], (OUT_SIZE, HIDDEN)),      # Linear weight
        "b_lin": u(ks[5], (OUT_SIZE,)),             # Linear bias
    }


def prepare_params(params):
    """One-time fusion / transpose / lane-padding of the weights (not per call)."""
    H, I, O, L = HIDDEN, IN_SIZE, OUT_SIZE, LANES
    w_ih, w_hh = params["w_ih"], params["w_hh"]
    b_ih, b_hh = params["b_ih"], params["b_hh"]
    w_lin, b_lin = params["w_lin"], params["b_lin"]

    # Fused GRU weight: rows 0:H act on h, rows H:H+I act on [x,pi_b], row H+I is
    # the bias row (multiplied by the constant-1 lane).  Column groups of 128:
    #   [0:L)   -> pre_r,  [L:2L) -> pre_z,  [2L:3L) -> gi_n,  [3L:4L) -> gh_n
    w_gru = jnp.zeros((L, 4 * L), jnp.float32)
    w_gru = w_gru.at[0:H, 0:H].set(w_hh[0:H].T)                       # W_hr
    w_gru = w_gru.at[0:H, L:L + H].set(w_hh[H:2 * H].T)               # W_hz
    w_gru = w_gru.at[0:H, 3 * L:3 * L + H].set(w_hh[2 * H:3 * H].T)   # W_hn
    w_gru = w_gru.at[H:H + I, 0:H].set(w_ih[0:H].T)                   # W_ir
    w_gru = w_gru.at[H:H + I, L:L + H].set(w_ih[H:2 * H].T)           # W_iz
    w_gru = w_gru.at[H:H + I, 2 * L:2 * L + H].set(w_ih[2 * H:3 * H].T)  # W_in
    w_gru = w_gru.at[H + I, 0:H].set(b_ih[0:H] + b_hh[0:H])           # b_r
    w_gru = w_gru.at[H + I, L:L + H].set(b_ih[H:2 * H] + b_hh[H:2 * H])  # b_z
    w_gru = w_gru.at[H + I, 2 * L:2 * L + H].set(b_ih[2 * H:3 * H])   # b_in
    w_gru = w_gru.at[H + I, 3 * L:3 * L + H].set(b_hh[2 * H:3 * H])   # b_hn

    # Fused linear weight: rows 0:H = W_lin^T, last row = bias (constant-1 lane).
    w_lin_big = jnp.zeros((L, L), jnp.float32)
    w_lin_big = w_lin_big.at[0:H, 0:O].set(w_lin.T)
    w_lin_big = w_lin_big.at[L - 1, 0:O].set(b_lin)

    return {"w_gru": w_gru, "w_lin": w_lin_big}


# ---------------------------------------------------------------------------
# Wrappers
# ---------------------------------------------------------------------------
def _pack_input_rows(x_cat_rows):
    """(T, IN_SIZE) concatenated [x, pi_b] rows -> (T, 1, LANES) packed rows."""
    T = x_cat_rows.shape[0]
    rows = jnp.zeros((T, LANES), jnp.float32)
    rows = rows.at[:, HIDDEN:HIDDEN + IN_SIZE].set(x_cat_rows.astype(jnp.float32))
    rows = rows.at[:, BIAS_LANE].set(1.0)
    return rows.reshape(T, 1, LANES)


def _pack_hidden(h_0):
    h0 = (jnp.zeros((HIDDEN,), jnp.float32) if h_0 is None
          else jnp.asarray(h_0, jnp.float32).reshape(HIDDEN))
    return jnp.zeros((1, LANES), jnp.float32).at[0, :HIDDEN].set(h0)


def drl_actor_forward(prep, x, pi_b=None, h_0=None):
    """Mirrors DRLActor.forward (seq_len=1, batch=1, 1 layer).

    Returns (output, probs): output (1, 1, HIDDEN), probs (OUT_SIZE,)."""
    if pi_b is None:
        pi_b = -1.0 * jnp.ones((OUT_SIZE,), jnp.float32)
    x_cat = jnp.concatenate([jnp.asarray(x, jnp.float32).reshape(-1),
                             jnp.asarray(pi_b, jnp.float32).reshape(-1)])
    x_rows = _pack_input_rows(x_cat.reshape(1, IN_SIZE))
    h0_pad = _pack_hidden(h_0)
    h_all, p_all = _build_call(1)(x_rows, h0_pad, prep["w_gru"], prep["w_lin"])
    output = h_all[0, 0, :HIDDEN].reshape(1, 1, HIDDEN)
    probs = p_all[0, 0, :OUT_SIZE]
    return output, probs


def drl_actor_rollout(prep, x_seq, pi_b_seq=None, h_0=None):
    """Run T GRU steps inside ONE pallas_call (launch + weight DMA amortized).

    x_seq: (T, RAW_X).  Returns (hidden_states (T, HIDDEN), probs (T, OUT_SIZE))."""
    T = x_seq.shape[0]
    if pi_b_seq is None:
        pi_b_seq = -1.0 * jnp.ones((T, OUT_SIZE), jnp.float32)
    x_cat_rows = jnp.concatenate(
        [jnp.asarray(x_seq, jnp.float32), jnp.asarray(pi_b_seq, jnp.float32)], axis=1)
    x_rows = _pack_input_rows(x_cat_rows)
    h0_pad = _pack_hidden(h_0)
    h_all, p_all = _build_call(T)(x_rows, h0_pad, prep["w_gru"], prep["w_lin"])
    return h_all[:, 0, :HIDDEN], p_all[:, 0, :OUT_SIZE]


# ---------------------------------------------------------------------------
# Pure-JAX reference (same math) for correctness checks
# ---------------------------------------------------------------------------
def _reference_forward(params, x, pi_b=None, h_0=None):
    if pi_b is None:
        pi_b = -1.0 * jnp.ones((OUT_SIZE,), jnp.float32)
    xc = jnp.concatenate([jnp.asarray(x, jnp.float32).reshape(-1),
                          jnp.asarray(pi_b, jnp.float32).reshape(-1)])
    h = (jnp.zeros((HIDDEN,), jnp.float32) if h_0 is None
         else jnp.asarray(h_0, jnp.float32).reshape(HIDDEN))
    gi = params["w_ih"] @ xc + params["b_ih"]
    gh = params["w_hh"] @ h + params["b_hh"]
    r = jax.nn.sigmoid(gi[:HIDDEN] + gh[:HIDDEN])
    z = jax.nn.sigmoid(gi[HIDDEN:2 * HIDDEN] + gh[HIDDEN:2 * HIDDEN])
    n = jnp.tanh(gi[2 * HIDDEN:] + r * gh[2 * HIDDEN:])
    h_new = (1 - z) * n + z * h
    logits = params["w_lin"] @ jnp.maximum(h_new, 0.0) + params["b_lin"]
    return h_new.reshape(1, 1, HIDDEN), jax.nn.softmax(logits)


if __name__ == "__main__":
    key = jax.random.PRNGKey(0)
    pkey, xkey, bkey, hkey = jax.random.split(key, 4)
    params = init_params(pkey)
    prep = prepare_params(params)

    # --- single step, default pi_b / h_0 (exactly DRLActor.forward) -----------
    x = jax.random.normal(xkey, (RAW_X,), jnp.float32)
    output, probs = jax.block_until_ready(drl_actor_forward(prep, x))
    ref_out, ref_probs = _reference_forward(params, x)
    assert output.shape == (1, 1, HIDDEN) and probs.shape == (OUT_SIZE,)
    assert jnp.allclose(output, ref_out, atol=1e-5)
    assert jnp.allclose(probs, ref_probs, atol=1e-5)
    assert jnp.allclose(jnp.sum(probs), 1.0, atol=1e-5)

    # --- single step with explicit pi_b and h_0 -------------------------------
    h0 = 0.1 * jax.random.normal(hkey, (HIDDEN,), jnp.float32)
    pib = jax.random.normal(bkey, (OUT_SIZE,), jnp.float32)
    out2, p2 = jax.block_until_ready(drl_actor_forward(prep, x, pi_b=pib, h_0=h0))
    ref_out2, ref_p2 = _reference_forward(params, x, pi_b=pib, h_0=h0)
    assert jnp.allclose(out2, ref_out2, atol=1e-5)
    assert jnp.allclose(p2, ref_p2, atol=1e-5)

    # --- multi-step rollout: recurrence inside one pallas_call ----------------
    T = 5
    xs = jax.random.normal(jax.random.PRNGKey(3), (T, RAW_X), jnp.float32)
    hs, ps = jax.block_until_ready(drl_actor_rollout(prep, xs))
    h_ref = jnp.zeros((HIDDEN,), jnp.float32)
    for t in range(T):
        o_r, p_r = _reference_forward(params, xs[t], h_0=h_ref)
        h_ref = o_r.reshape(HIDDEN)
        assert jnp.allclose(hs[t], h_ref, atol=1e-5)
        assert jnp.allclose(ps[t], p_r, atol=1e-5)

    print("KERNEL_OK")
</pallas_src>

<mosaic_0001>
module attributes {stable_mosaic.version = 11 : i64} {
  func.func @_drl_actor_kernel(%arg0: i32, %arg1: memref<1x1x128xf32, #tpu.memory_space<vmem>>, %arg2: memref<1x128xf32, #tpu.memory_space<vmem>>, %arg3: memref<128x512xf32, #tpu.memory_space<vmem>>, %arg4: memref<128x128xf32, #tpu.memory_space<vmem>>, %arg5: memref<1x1x128xf32, #tpu.memory_space<vmem>>, %arg6: memref<1x1x128xf32, #tpu.memory_space<vmem>>, %arg7: memref<1x128xf32, #tpu.memory_space<vmem>>) attributes {dimension_semantics = [#tpu.dimension_semantics<arbitrary>], iteration_bounds = array<i64: 1>, scalar_prefetch = 0 : i64, scratch_operands = 1 : i64, tpu.core_type = #tpu.core_type<tc>, window_params = [{transform_indices = @transform_0, window_bounds = array<i64: 1, 1, 128>}, {pipeline_mode = #tpu.pipeline_mode<synchronous>, transform_indices = @transform_1, window_bounds = array<i64: 1, 128>}, {pipeline_mode = #tpu.pipeline_mode<synchronous>, transform_indices = @transform_2, window_bounds = array<i64: 128, 512>}, {pipeline_mode = #tpu.pipeline_mode<synchronous>, transform_indices = @transform_3, window_bounds = array<i64: 128, 128>}, {transform_indices = @transform_4, window_bounds = array<i64: 1, 1, 128>}, {transform_indices = @transform_5, window_bounds = array<i64: 1, 1, 128>}]} {
    %c0_i32 = arith.constant 0 : i32
    %0 = arith.cmpi eq, %arg0, %c0_i32 : i32
    %1 = arith.extui %0 : i1 to i32
    %c0_i32_0 = arith.constant 0 : i32
    %2 = arith.cmpi ne, %1, %c0_i32_0 : i32
    scf.if %2 {
      %c0_26 = arith.constant 0 : index
      %c0_27 = arith.constant 0 : index
      %60 = vector.load %arg2[%c0_26, %c0_27] : memref<1x128xf32, #tpu.memory_space<vmem>>, vector<1x128xf32>
      %c0_28 = arith.constant 0 : index
      %c0_29 = arith.constant 0 : index
      %61 = vector.load %arg7[%c0_28, %c0_29] : memref<1x128xf32, #tpu.memory_space<vmem>>, vector<1x128xf32>
      tpu.vector_store %arg7[%c0_28, %c0_29], %60 {strides = array<i32>} : memref<1x128xf32, #tpu.memory_space<vmem>>, vector<1x128xf32>,
    } else {
    }
    %c0 = arith.constant 0 : index
    %c0_1 = arith.constant 0 : index
    %3 = vector.load %arg7[%c0, %c0_1] : memref<1x128xf32, #tpu.memory_space<vmem>>, vector<1x128xf32>
    %c0_2 = arith.constant 0 : index
    %c0_3 = arith.constant 0 : index
    %c0_4 = arith.constant 0 : index
    %4 = vector.load %arg1[%c0_2, %c0_3, %c0_4] : memref<1x1x128xf32, #tpu.memory_space<vmem>>, vector<1x1x128xf32>
    %5 = vector.shape_cast %4 : vector<1x1x128xf32> to vector<1x128xf32>
    %6 = arith.addf %5, %3 : vector<1x128xf32>
    %c0_5 = arith.constant 0 : index
    %c0_6 = arith.constant 0 : index
    %7 = vector.load %arg3[%c0_5, %c0_6] : memref<128x512xf32, #tpu.memory_space<vmem>>, vector<128x512xf32>
    %cst = arith.constant dense<0.000000e+00> : vector<1x512xf32>
    %8 = tpu.matmul %6, %7, %cst {dimension_numbers = #tpu.dot_dimension_numbers<[1], [0], [0], [1], [0, 0, 1, 1], [], []>} : vector<1x128xf32>, vector<128x512xf32>, vector<1x512xf32> -> vector<1x512xf32>
    %9 = vector.extract_strided_slice %8 {offsets = [0, 0], sizes = [1, 128], strides = [1, 1]} : vector<1x512xf32> to vector<1x128xf32>
    %10 = arith.negf %9 : vector<1x128xf32>
    %11 = math.exp %10 : vector<1x128xf32>
    %cst_7 = arith.constant 1.000000e+00 : f32
    %12 = vector.broadcast %cst_7 : f32 to vector<1x128xf32>
    %13 = arith.addf %12, %11 : vector<1x128xf32>
    %14 = arith.divf %12, %13 : vector<1x128xf32>
    %15 = vector.extract_strided_slice %8 {offsets = [0, 128], sizes = [1, 128], strides = [1, 1]} : vector<1x512xf32> to vector<1x128xf32>
    %16 = arith.negf %15 : vector<1x128xf32>
    %17 = math.exp %16 : vector<1x128xf32>
    %cst_8 = arith.constant 1.000000e+00 : f32
    %18 = vector.broadcast %cst_8 : f32 to vector<1x128xf32>
    %19 = arith.addf %18, %17 : vector<1x128xf32>
    %20 = arith.divf %18, %19 : vector<1x128xf32>
    %21 = vector.extract_strided_slice %8 {offsets = [0, 256], sizes = [1, 128], strides = [1, 1]} : vector<1x512xf32> to vector<1x128xf32>
    %22 = vector.extract_strided_slice %8 {offsets = [0, 384], sizes = [1, 128], strides = [1, 1]} : vector<1x512xf32> to vector<1x128xf32>
    %23 = arith.mulf %14, %22 : vector<1x128xf32>
    %24 = arith.addf %21, %23 : vector<1x128xf32>
    %25 = math.tanh %24 : vector<1x128xf32>
    %cst_9 = arith.constant 1.000000e+00 : f32
    %26 = vector.broadcast %cst_9 : f32 to vector<1x128xf32>
    %27 = arith.subf %26, %20 : vector<1x128xf32>
    %28 = arith.mulf %27, %25 : vector<1x128xf32>
    %29 = arith.mulf %20, %3 : vector<1x128xf32>
    %30 = arith.addf %28, %29 : vector<1x128xf32>
    %c0_10 = arith.constant 0 : index
    %c0_11 = arith.constant 0 : index
    %31 = vector.load %arg7[%c0_10, %c0_11] : memref<1x128xf32, #tpu.memory_space<vmem>>, vector<1x128xf32>
    tpu.vector_store %arg7[%c0_10, %c0_11], %30 {strides = array<i32>} : memref<1x128xf32, #tpu.memory_space<vmem>>, vector<1x128xf32>,
    %c0_12 = arith.constant 0 : index
    %c0_13 = arith.constant 0 : index
    %c0_14 = arith.constant 0 : index
    %32 = vector.load %arg5[%c0_12, %c0_13, %c0_14] : memref<1x1x128xf32, #tpu.memory_space<vmem>>, vector<1x1x128xf32>
    %33 = vector.shape_cast %32 : vector<1x1x128xf32> to vector<1x128xf32>
    %34 = vector.shape_cast %30 : vector<1x128xf32> to vector<1x1x128xf32>
    tpu.vector_store %arg5[%c0_12, %c0_13, %c0_14], %34 {strides = array<i32>} : memref<1x1x128xf32, #tpu.memory_space<vmem>>, vector<1x1x128xf32>,
    %35 = tpu.iota {dimensions = array<i32: 1>} : vector<1x128xi32>
    %cst_15 = arith.constant 0.000000e+00 : f32
    %36 = vector.broadcast %cst_15 : f32 to vector<1x128xf32>
    %37 = arith.maximumf %30, %36 : vector<1x128xf32>
    %c127_i32 = arith.constant 127 : i32
    %38 = vector.broadcast %c127_i32 : i32 to vector<1x128xi32>
    %39 = arith.cmpi eq, %35, %38 : vector<1x128xi32>
    %cst_16 = arith.constant 1.000000e+00 : f32
    %40 = vector.broadcast %cst_16 : f32 to vector<1x128xf32>
    %41 = arith.select %39, %40, %37 : vector<1x128xi1>, vector<1x128xf32>
    %c0_17 = arith.constant 0 : index
    %c0_18 = arith.constant 0 : index
    %42 = vector.load %arg4[%c0_17, %c0_18] : memref<128x128xf32, #tpu.memory_space<vmem>>, vector<128x128xf32>
    %cst_19 = arith.constant dense<0.000000e+00> : vector<1x128xf32>
    %43 = tpu.matmul %41, %42, %cst_19 {dimension_numbers = #tpu.dot_dimension_numbers<[1], [0], [0], [1], [0, 0, 1, 1], [], []>} : vector<1x128xf32>, vector<128x128xf32>, vector<1x128xf32> -> vector<1x128xf32>
    %c4_i32 = arith.constant 4 : i32
    %44 = vector.broadcast %c4_i32 : i32 to vector<1x128xi32>
    %45 = arith.cmpi slt, %35, %44 : vector<1x128xi32>
    %cst_20 = arith.constant -1.000000e+30 : f32
    %46 = vector.broadcast %cst_20 : f32 to vector<1x128xf32>
    %47 = arith.select %45, %43, %46 : vector<1x128xi1>, vector<1x128xf32>
    %cst_21 = arith.constant dense<0xFF800000> : vector<1xf32>
    %48 = vector.multi_reduction <maximumf>, %47, %cst_21 [1] : vector<1x128xf32> to vector<1xf32>
    %49 = vector.shape_cast %48 : vector<1xf32> to vector<1x1xf32>
    %50 = vector.broadcast %49 : vector<1x1xf32> to vector<1x128xf32>
    %51 = arith.subf %47, %50 : vector<1x128xf32>
    %52 = math.exp %51 : vector<1x128xf32>
    %cst_22 = arith.constant dense<0.000000e+00> : vector<1xf32>
    %53 = vector.multi_reduction <add>, %52, %cst_22 [1] : vector<1x128xf32> to vector<1xf32>
    %54 = vector.shape_cast %53 : vector<1xf32> to vector<1x1xf32>
    %55 = vector.broadcast %54 : vector<1x1xf32> to vector<1x128xf32>
    %56 = arith.divf %52, %55 : vector<1x128xf32>
    %c0_23 = arith.constant 0 : index
    %c0_24 = arith.constant 0 : index
    %c0_25 = arith.constant 0 : index
    %57 = vector.load %arg6[%c0_23, %c0_24, %c0_25] : memref<1x1x128xf32, #tpu.memory_space<vmem>>, vector<1x1x128xf32>
    %58 = vector.shape_cast %57 : vector<1x1x128xf32> to vector<1x128xf32>
    %59 = vector.shape_cast %56 : vector<1x128xf32> to vector<1x1x128xf32>
    tpu.vector_store %arg6[%c0_23, %c0_24, %c0_25], %59 {strides = array<i32>} : memref<1x1x128xf32, #tpu.memory_space<vmem>>, vector<1x1x128xf32>,
    return
  }
  func.func @transform_0(%arg0: i32) -> (i32, i32, i32) {
    %c0_i32 = arith.constant 0 : i32
    %c0_i32_0 = arith.constant 0 : i32
    %c0_i32_1 = arith.constant 0 : i32
    return %arg0, %c0_i32, %c0_i32_0 : i32, i32, i32
  }
  func.func @transform_1(%arg0: i32) -> (i32, i32) {
    %c0_i32 = arith.constant 0 : i32
    %c0_i32_0 = arith.constant 0 : i32
    %c0_i32_1 = arith.constant 0 : i32
    return %c0_i32, %c0_i32_0 : i32, i32
  }
  func.func @transform_2(%arg0: i32) -> (i32, i32) {
    %c0_i32 = arith.constant 0 : i32
    %c0_i32_0 = arith.constant 0 : i32
    %c0_i32_1 = arith.constant 0 : i32
    return %c0_i32, %c0_i32_0 : i32, i32
  }
  func.func @transform_3(%arg0: i32) -> (i32, i32) {
    %c0_i32 = arith.constant 0 : i32
    %c0_i32_0 = arith.constant 0 : i32
    %c0_i32_1 = arith.constant 0 : i32
    return %c0_i32, %c0_i32_0 : i32, i32
  }
  func.func @transform_4(%arg0: i32) -> (i32, i32, i32) {
    %c0_i32 = arith.constant 0 : i32
    %c0_i32_0 = arith.constant 0 : i32
    %c0_i32_1 = arith.constant 0 : i32
    return %arg0, %c0_i32, %c0_i32_0 : i32, i32, i32
  }
  func.func @transform_5(%arg0: i32) -> (i32, i32, i32) {
    %c0_i32 = arith.constant 0 : i32
    %c0_i32_0 = arith.constant 0 : i32
    %c0_i32_1 = arith.constant 0 : i32
    return %arg0, %c0_i32, %c0_i32_0 : i32, i32, i32
  }
}

</mosaic_0001>

<bundles_post_ra>
// kernel: tpu_custom_call.1
= control target key start
LH: loop header
LB: loop body
LE: loop exit
PB: predicated region body
PF: predicated region fallthrough
CT: control target
= control target key end

     0   :  { %11 = vsyncpa [#allocation4], 0  ;;  %s830_s0 = inlined_call_operand.hbm [shape: f32[1,1,128], index: 0, kind: input, shape index: {}]   ;;  %s831_s1 = inlined_call_operand.vmem [shape: f32[1,128], index: 1, kind: input, shape index: {}]   ;;  %s832_s2 = inlined_call_operand.hbm [shape: f32[128,512], index: 2, kind: input, shape index: {}]   ;;  %s833_s3 = inlined_call_operand.hbm [shape: f32[128,128], index: 3, kind: input, shape index: {}]   ;;  %s834_s4 = inlined_call_operand.hbm [shape: f32[1,1,128], index: 4, kind: output, shape index: {0}]   ;;  %s835_s5 = inlined_call_operand.hbm [shape: f32[1,1,128], index: 5, kind: output, shape index: {1}]  }
   0x1   :  { %12 = vsyncpa [#allocation7], 0 }
   0x2   :  { %13 = vsyncpa [#allocation5], 0 }
   0x3   :  { %14 = vsyncpa [#allocation11], 0  ;;  %s718_s18 = smov [#allocation6]   ;;  %s600_s22 = scalar_lea.hbm %s832_s2, 8192 }
   0x4   :  { %s32_s19 = sshll.u32 %s718_s18, 4  ;;  %p601_p0 = scmp.ne.s32.totalorder %s832_s2, %s600_s22  ;;  %s33_s19 = int_to_ptr.vmem [resolvable:$true] %s32_s19 }
   0x5   :  { %p604_p1 = scmp.lt.u32.totalorder %s600_s22, %s832_s2 }
   0x7   :  { %p606_p2 = pnand %p604_p1, %p601_p0 }
   0x9   :  { %609 = shalt.err (!%p606_p2)
}
   0xa   :  { %s610_s27 = scalar_lea.vmem %s33_s19, 8192  ;;  %p615_p4 = scmp.lt.s32.totalorder %s33_s19, %s33_s19 }
   0xb   :  { %p611_p3 = scmp.ne.s32.totalorder %s33_s19, %s610_s27  ;;  %p616_p5 = scmp.lt.s32.totalorder %s610_s27, %s610_s27 }
   0xd   :  { %p617_p6 = por %p616_p5, %p615_p4 }
   0xf   :  { %p618_p7 = pnand %p617_p6, %p611_p3 }
  0x11   :  { %621 = shalt.err (!%p618_p7)
}
  0x12   :  { %s719_s28 = smov 512   ;;  %s720_s29 = smov 32  }
  0x13   :  { %38 = dma.hbm_to_vmem [thread:$0]  %s832_s2, 8192, %s33_s19, [#allocation7], %s719_s28, %s719_s28, %s720_s29  }
  0x14   :  { %s721_s7 = smov [#allocation3]   ;;  %s722_s9 = smov [#allocation8]  }
  0x15   :  { %s21_s8 = sshll.u32 %s721_s7, 4  ;;  %s44_s10 = sshll.u32 %s722_s9, 4  ;;  %s22_s8 = int_to_ptr.vmem [resolvable:$true] %s21_s8  ;;  %s45_s10 = int_to_ptr.vmem [resolvable:$true] %s44_s10 }
  0x16   :  { %s622_s13 = scalar_lea.hbm %s830_s0, 16 }
  0x17   :  { %p623_p8 = scmp.ne.s32.totalorder %s830_s0, %s622_s13  ;;  %p626_p9 = scmp.lt.u32.totalorder %s622_s13, %s830_s0 }
  0x19   :  { %p628_p10 = pnand %p626_p9, %p623_p8 }
  0x1b   :  { %631 = shalt.err (!%p628_p10)
}
  0x1c   :  { %s632_s2 = scalar_lea.vmem %s22_s8, 16  ;;  %s636_s18 = scalar_lea.vmem %s22_s8, 32 }
  0x1d   :  { %p633_p11 = scmp.ne.s32.totalorder %s22_s8, %s632_s2  ;;  %p637_p12 = scmp.lt.s32.totalorder %s22_s8, %s22_s8 }
  0x1e   :  { %p638_p13 = scmp.lt.s32.totalorder %s636_s18, %s632_s2 }
  0x20   :  { %p639_p0 = por %p638_p13, %p637_p12 }
  0x22   :  { %p640_p1 = pnand %p639_p0, %p633_p11 }
  0x24   :  { %643 = shalt.err (!%p640_p1)
}
  0x25   :  { %24 = dma.hbm_to_vmem [thread:$0]  %s830_s0, 16, %s22_s8, [#allocation4]  }
  0x26   :  { %s644_s23 = scalar_lea.hbm %s833_s3, 2048 }
  0x27   :  { %p645_p2 = scmp.ne.s32.totalorder %s833_s3, %s644_s23  ;;  %p648_p3 = scmp.lt.u32.totalorder %s644_s23, %s833_s3 }
  0x29   :  { %p650_p4 = pnand %p648_p3, %p645_p2 }
  0x2b   :  { %653 = shalt.err (!%p650_p4)
}
  0x2c   :  { %s654_s28 = scalar_lea.vmem %s45_s10, 2048  ;;  %p659_p6 = scmp.lt.s32.totalorder %s45_s10, %s45_s10 }
  0x2d   :  { %p655_p5 = scmp.ne.s32.totalorder %s45_s10, %s654_s28  ;;  %p660_p7 = scmp.lt.s32.totalorder %s654_s28, %s654_s28 }
  0x2f   :  { %p661_p8 = por %p660_p7, %p659_p6 }
  0x31   :  { %p662_p9 = pnand %p661_p8, %p655_p5 }
  0x33   :  { %665 = shalt.err (!%p662_p9)
}
  0x34   :  { %s723_s0 = smov 128   ;;  %s724_s29 = smov 8  }
  0x35   :  { %50 = dma.hbm_to_vmem [thread:$0]  %s833_s3, 2048, %s45_s10, [#allocation7], %s723_s0, %s723_s0, %s724_s29  }
  0x36   :  { %710 = dma.done.wait [#allocation4], 16  }
  0x37   :  { %711 = vsyncadd [#allocation4], 4294967280 }
  0x38   :  { %712 = dma.done.wait [#allocation7], 10240  }
  0x39   :  { %713 = vsyncadd [#allocation7], 4294957056  ;;  %v725_v0 = vmov 0.0   ;;  %v70_v1 = vld [vmem:[#allocation6 + $0x8] sm:$0xff]  ;;  %v69_v3 = vld [vmem:[#allocation6] sm:$0xff]  ;;  %vm727_vm0 = vmmov 0  }
  0x3a   :  { %197 = vmatprep.mubr.f32.mxu0 %v725_v0  ;;  %268 = vmatprep.mubr.f32.mxu1 %v725_v0  ;;  %v74_v2 = vld [vmem:[#allocation6 + $0x28] sm:$0xff]  ;;  %v73_v5 = vld [vmem:[#allocation6 + $0x20] sm:$0xff]  ;;  %v72_v22 = vld [vmem:[#allocation6 + $0x18] sm:$0xff]  ;;  %vm389_vm3 = vcmask 1040384  }
  0x3b   :  { %v486_v4 = vpack.c.bf16 %v74_v2, %v70_v1  ;;  %v78_v6 = vld [vmem:[#allocation6 + $0x48] sm:$0xff]  ;;  %v488_v8 = vpack.c.bf16 %v73_v5, %v69_v3  ;;  %v77_v10 = vld [vmem:[#allocation6 + $0x40] sm:$0xff]  ;;  %v76_v26 = vld [vmem:[#allocation6 + $0x38] sm:$0xff] }
  0x3c   :  { %v82_v7 = vld [vmem:[#allocation6 + $0x68] sm:$0xff]  ;;  %v81_v11 = vld [vmem:[#allocation6 + $0x60] sm:$0xff]  ;;  %v518_v28 = vpack.c.bf16 %v76_v26, %v72_v22  ;;  %v71_v29 = vld [vmem:[#allocation6 + $0x10] sm:$0xff] }
  0x3d   :  { %v490_v9 = vpack.c.bf16 %v82_v7, %v78_v6  ;;  %v86_v12 = vld [vmem:[#allocation6 + $0x88] sm:$0xff]  ;;  %487 = vmatprep.subr.bf16.mxu0 %v486_v4  ;;  %v492_v14 = vpack.c.bf16 %v81_v11, %v77_v10  ;;  %v85_v16 = vld [vmem:[#allocation6 + $0x80] sm:$0xff]  ;;  %v75_v30 = vld [vmem:[#allocation6 + $0x30] sm:$0xff] }
  0x3e   :  { %v90_v13 = vld [vmem:[#allocation6 + $0xa8] sm:$0xff]  ;;  %489 = vmatpush1.bf16.msra.mxu0 %v488_v8  ;;  %v89_v17 = vld [vmem:[#allocation6 + $0xa0] sm:$0xff]  ;;  %v520_v32 = vpack.c.bf16 %v75_v30, %v71_v29  ;;  %v80_v33 = vld [vmem:[#allocation6 + $0x58] sm:$0xff]  ;;  %519 = vmatprep.subr.bf16.mxu1 %v518_v28 }
  0x3f   :  { %491 = vmatprep.subr.bf16.mxu0 %v490_v9  ;;  %v494_v15 = vpack.c.bf16 %v90_v13, %v86_v12  ;;  %v94_v18 = vld [vmem:[#allocation6 + $0xc8] sm:$0xff]  ;;  %v496_v20 = vpack.c.bf16 %v89_v17, %v85_v16  ;;  %v93_v21 = vld [vmem:[#allocation6 + $0xc0] sm:$0xff]  ;;  %v84_v34 = vld [vmem:[#allocation6 + $0x78] sm:$0xff] }
  0x40   :  { %v98_v19 = vld [vmem:[#allocation6 + $0xe8] sm:$0xff]  ;;  %v97_v24 = vld [vmem:[#allocation6 + $0xe0] sm:$0xff]  ;;  %v522_v38 = vpack.c.bf16 %v84_v34, %v80_v33  ;;  %v79_v39 = vld [vmem:[#allocation6 + $0x50] sm:$0xff]  ;;  %521 = vmatpush1.bf16.msra.mxu1 %v520_v32 }
  0x41   :  { %v498_v23 = vpack.c.bf16 %v98_v19, %v94_v18  ;;  %v102_v25 = vld [vmem:[#allocation6 + $0x108] sm:$0xff]  ;;  %v101_v31 = vld [vmem:[#allocation6 + $0x100] sm:$0xff]  ;;  %v500_v35 = vpack.c.bf16 %v97_v24, %v93_v21  ;;  %v83_v42 = vld [vmem:[#allocation6 + $0x70] sm:$0xff] }
  0x42   :  { %493 = vmatpush1.bf16.msra.mxu0 %v492_v14  ;;  %v106_v27 = vld [vmem:[#allocation6 + $0x128] sm:$0xff]  ;;  %v105_v36 = vld [vmem:[#allocation6 + $0x120] sm:$0xff]  ;;  %v64_v43 = vld [vmem:[%s831_s1] sm:$0x1]  ;;  %523 = vmatprep.subr.bf16.mxu1 %v522_v38  ;;  %v524_v44 = vpack.c.bf16 %v83_v42, %v79_v39  ;;  %s728_s1 = smov [#allocation9]  }
  0x43   :  { %495 = vmatprep.subr.bf16.mxu0 %v494_v15  ;;  %v110_v37 = vld [vmem:[#allocation6 + $0x148] sm:$0xff]  ;;  %v502_v40 = vpack.c.bf16 %v106_v27, %v102_v25  ;;  %65 = vst [vmem:[#allocation2] sm:$0x1] %v64_v43  ;;  %v88_v45 = vld [vmem:[#allocation6 + $0x98] sm:$0xff]  ;;  %v87_v47 = vld [vmem:[#allocation6 + $0x90] sm:$0xff]  ;;  %v504_v52 = vpack.c.bf16 %v105_v36, %v101_v31  ;;  %s408_s8 = sshll.u32 %s728_s1, 4  ;;  %s409_s8 = int_to_ptr.vmem [resolvable:$true] %s408_s8 }
  0x44   :  { %v114_v41 = vld [vmem:[#allocation6 + $0x168] sm:$0xff]  ;;  %v92_v46 = vld [vmem:[#allocation6 + $0xb8] sm:$0xff]  ;;  %v91_v49 = vld [vmem:[#allocation6 + $0xb0] sm:$0xff]  ;;  %525 = vmatpush1.bf16.msra.mxu1 %v524_v44  ;;  %s666_s9 = scalar_lea.vmem %s409_s8, 16  ;;  %s670_s10 = scalar_lea.vmem %s409_s8, 32 }
  0x45   :  { %v526_v48 = vpack.c.bf16 %v92_v46, %v88_v45  ;;  %v96_v50 = vld [vmem:[#allocation6 + $0xd8] sm:$0xff]  ;;  %v506_v53 = vpack.c.bf16 %v114_v41, %v110_v37  ;;  %v109_v54 = vld [vmem:[#allocation6 + $0x140] sm:$0xff]  ;;  %v118_v56 = vld [vmem:[#allocation6 + $0x188] sm:$0xff]  ;;  %v528_v57 = vpack.c.bf16 %v91_v49, %v87_v47  ;;  %v726_v41 = vmov 0.0|0.0   ;;  %p667_p10 = scmp.ne.s32.totalorder %s409_s8, %s666_s9  ;;  %p671_p11 = scmp.lt.s32.totalorder %s409_s8, %s409_s8 }
  0x46   :  { %497 = vmatpush1.bf16.msra.mxu0 %v496_v20  ;;  %v100_v51 = vld [vmem:[#allocation6 + $0xf8] sm:$0xff]  ;;  %v113_v55 = vld [vmem:[#allocation6 + $0x160] sm:$0xff]  ;;  %v122_v58 = vld [vmem:[#allocation6 + $0x1a8] sm:$0xff]  ;;  %p672_p12 = scmp.lt.s32.totalorder %s670_s10, %s666_s9 }
  0x47   :  { %499 = vmatprep.subr.bf16.mxu0 %v498_v23  ;;  %527 = vmatprep.subr.bf16.mxu1 %v526_v48  ;;  %v530_v59 = vpack.c.bf16 %v100_v51, %v96_v50  ;;  %v95_v60 = vld [vmem:[#allocation6 + $0xd0] sm:$0xff]  ;;  %v104_v62 = vld [vmem:[#allocation6 + $0x118] sm:$0xff]  ;;  %v508_v1 = vpack.c.bf16 %v113_v55, %v109_v54  ;;  %v510_v2 = vpack.c.bf16 %v122_v58, %v118_v56  ;;  %v117_v3 = vld [vmem:[#allocation6 + $0x180] sm:$0xff] }
  0x48   :  { %v99_v61 = vld [vmem:[#allocation6 + $0xf0] sm:$0xff]  ;;  %v108_v63 = vld [vmem:[#allocation6 + $0x138] sm:$0xff]  ;;  %v121_v4 = vld [vmem:[#allocation6 + $0x1a0] sm:$0xff]  ;;  %529 = vmatpush1.bf16.msra.mxu1 %v528_v57  ;;  %p673_p13 = por %p672_p12, %p671_p11 }
  0x49   :  { %v126_v5 = vld [vmem:[#allocation6 + $0x1c8] sm:$0xff]  ;;  %v532_v6 = vpack.c.bf16 %v99_v61, %v95_v60  ;;  %531 = vmatprep.subr.bf16.mxu1 %v530_v59  ;;  %v534_v8 = vpack.c.bf16 %v108_v63, %v104_v62  ;;  %v103_v9 = vld [vmem:[#allocation6 + $0x110] sm:$0xff]  ;;  %v112_v11 = vld [vmem:[#allocation6 + $0x158] sm:$0xff]  ;;  %v512_v13 = vpack.c.bf16 %v121_v4, %v117_v3 }
  0x4a   :  { %501 = vmatpush1.bf16.msra.mxu0 %v500_v35  ;;  %v130_v7 = vld [vmem:[#allocation6 + $0x1e8] sm:$0xff]  ;;  %v107_v10 = vld [vmem:[#allocation6 + $0x130] sm:$0xff]  ;;  %v116_v12 = vld [vmem:[#allocation6 + $0x178] sm:$0xff]  ;;  %p674_p0 = pnand %p673_p13, %p667_p10 }
  0x4b   :  { %503 = vmatprep.subr.bf16.mxu0 %v502_v40  ;;  %v514_v14 = vpack.c.bf16 %v130_v7, %v126_v5  ;;  %v125_v15 = vld [vmem:[#allocation6 + $0x1c0] sm:$0xff]  ;;  %v536_v17 = vpack.c.bf16 %v107_v10, %v103_v9  ;;  %v538_v18 = vpack.c.bf16 %v116_v12, %v112_v11  ;;  %v111_v19 = vld [vmem:[#allocation6 + $0x150] sm:$0xff]  ;;  %v120_v21 = vld [vmem:[#allocation6 + $0x198] sm:$0xff] }
  0x4c   :  { %v129_v16 = vld [vmem:[#allocation6 + $0x1e0] sm:$0xff]  ;;  %533 = vmatpush1.bf16.msra.mxu1 %v532_v6  ;;  %v115_v20 = vld [vmem:[#allocation6 + $0x170] sm:$0xff]  ;;  %v124_v22 = vld [vmem:[#allocation6 + $0x1b8] sm:$0xff] }
  0x4d   :  { %535 = vmatprep.subr.bf16.mxu1 %v534_v8  ;;  %v516_v23 = vpack.c.bf16 %v129_v16, %v125_v15  ;;  %v801_v24 = vld [vmem:[#allocation2] sm:$0x1]  ;;  %v67_v25 = vld [vmem:[#allocation3] sm:$0x1]  ;;  %v540_v26 = vpack.c.bf16 %v115_v20, %v111_v19  ;;  %v542_v27 = vpack.c.bf16 %v124_v22, %v120_v21  ;;  %v119_v28 = vld [vmem:[#allocation6 + $0x190] sm:$0xff] }
  0x4e   :  { %505 = vmatpush1.bf16.msra.mxu0 %v504_v52  ;;  %v123_v29 = vld [vmem:[#allocation6 + $0x1b0] sm:$0xff]  ;;  %v68_v30 = vadd.f32 %v67_v25, %v801_v24  ;;  %v128_v31 = vld [vmem:[#allocation6 + $0x1d8] sm:$0xff]  ;;  %v301_v38 = vld [vmem:[#allocation8] sm:$0xff] }
  0x4f   :  { %507 = vmatprep.subr.bf16.mxu0 %v506_v53  ;;  %v132_v32 = vld [vmem:[#allocation6 + $0x1f8] sm:$0xff]  ;;  %v544_v33 = vpack.c.bf16 %v123_v29, %v119_v28  ;;  %v127_v35 = vld [vmem:[#allocation6 + $0x1d0] sm:$0xff]  ;;  %v302_v39 = vld [vmem:[#allocation8 + $0x8] sm:$0xff] }
  0x50   :  { %537 = vmatpush1.bf16.msra.mxu1 %v536_v17  ;;  %v546_v34 = vpack.c.bf16 %v132_v32, %v128_v31  ;;  %v131_v36 = vld [vmem:[#allocation6 + $0x1f0] sm:$0xff]  ;;  %v551_v40 = vpack.c.bf16 %v302_v39, %v301_v38  ;;  %v304_v43 = vld [vmem:[#allocation8 + $0x18] sm:$0xff]  ;;  %v305_v45 = vld [vmem:[#allocation8 + $0x20] sm:$0xff] }
  0x51   :  { %539 = vmatprep.subr.bf16.mxu1 %v538_v18  ;;  %v548_v37 = vpack.c.bf16 %v131_v36, %v127_v35  ;;  %v303_v42 = vld [vmem:[#allocation8 + $0x10] sm:$0xff]  ;;  %v306_v46 = vld [vmem:[#allocation8 + $0x28] sm:$0xff]  ;;  %v308_v49 = vld [vmem:[#allocation8 + $0x38] sm:$0xff] }
  0x52   :  { %509 = vmatpush1.bf16.msra.mxu0 %v508_v1  ;;  %v554_v44 = vpack.c.bf16 %v304_v43, %v303_v42  ;;  %v557_v47 = vpack.c.bf16 %v306_v46, %v305_v45  ;;  %v307_v48 = vld [vmem:[#allocation8 + $0x30] sm:$0xff]  ;;  %v309_v51 = vld [vmem:[#allocation8 + $0x40] sm:$0xff]  ;;  %v310_v52 = vld [vmem:[#allocation8 + $0x48] sm:$0xff] }
  0x53   :  { %511 = vmatprep.subr.bf16.mxu0 %v510_v2  ;;  %v560_v50 = vpack.c.bf16 %v308_v49, %v307_v48  ;;  %v311_v53 = vld [vmem:[#allocation8 + $0x50] sm:$0xff]  ;;  %v563_v54 = vpack.c.bf16 %v310_v52, %v309_v51  ;;  %v312_v55 = vld [vmem:[#allocation8 + $0x58] sm:$0xff]  ;;  %v313_v57 = vld [vmem:[#allocation8 + $0x60] sm:$0xff] }
  0x54   :  { %541 = vmatpush1.bf16.msra.mxu1 %v540_v26  ;;  %v566_v56 = vpack.c.bf16 %v312_v55, %v311_v53  ;;  %v314_v58 = vld [vmem:[#allocation8 + $0x68] sm:$0xff]  ;;  %v315_v60 = vld [vmem:[#allocation8 + $0x70] sm:$0xff]  ;;  %v316_v61 = vld [vmem:[#allocation8 + $0x78] sm:$0xff] }
  0x55   :  { %543 = vmatprep.subr.bf16.mxu1 %v542_v27  ;;  %v569_v59 = vpack.c.bf16 %v314_v58, %v313_v57  ;;  %v572_v62 = vpack.c.bf16 %v316_v61, %v315_v60 }
  0x56   :  { %513 = vmatpush1.bf16.msra.mxu0 %v512_v13  ;;  %v296_v13 = vlaneseq }
  0x57   :  { %515 = vmatprep.subr.bf16.mxu0 %v514_v14 }
  0x58   :  { %545 = vmatpush1.bf16.msra.mxu1 %v544_v33  ;;  %v297_v16 = vand.u32 127, %v296_v13 }
  0x59   :  { %547 = vmatprep.subr.bf16.mxu1 %v546_v34 }
  0x5a   :  { %517 = vmatpush1.bf16.msra.mxu0 %v516_v23  ;;  %vm299_vm1 = vcmp.eq.s32.totalorder %v297_v16, 127  ;;  %vm387_vm2 = vcmp.lt.s32.totalorder %v297_v16, 4 }
  0x5b   :  { %550 = vmatprep.subr.bf16.mxu0 %v726_v41 }
  0x5c   :  { %549 = vmatpush1.bf16.msra.mxu1 %v548_v37 }
  0x5d   :  { %198 = vmatmul.mubr.f32.vlgmr.msra.gmra.mrb[0].mxu0 %v68_v30 }
  0x5e   :  { %552 = vmatpush3.bf16.msra.mxu0 %v551_v40  ;;  %483 = vmatprep.mubr.msk.f32.mxu0 %vm727_vm0, %v725_v0 }
  0x5f   :  { %269 = vmatmul.mubr.f32.vlgmr.msra.gmra.mrb[0].mxu1 %v68_v30  ;;  %553 = vmatprep.subr.bf16.mxu0 %v726_v41 }
  0x62   :  { %555 = vmatpush3.bf16.msra.mxu0 %v554_v44 }
  0x63   :  { %556 = vmatprep.subr.bf16.mxu0 %v726_v41 }
  0x66   :  { %558 = vmatpush3.bf16.msra.mxu0 %v557_v47 }
  0x67   :  { %559 = vmatprep.subr.bf16.mxu0 %v726_v41 }
  0x6a   :  { %561 = vmatpush3.bf16.msra.mxu0 %v560_v50 }
  0x6b   :  { %562 = vmatprep.subr.bf16.mxu0 %v726_v41 }
  0x6e   :  { %564 = vmatpush3.bf16.msra.mxu0 %v563_v54 }
  0x6f   :  { %565 = vmatprep.subr.bf16.mxu0 %v726_v41 }
  0x72   :  { %567 = vmatpush3.bf16.msra.mxu0 %v566_v56 }
  0x73   :  { %568 = vmatprep.subr.bf16.mxu0 %v726_v41 }
  0x76   :  { %570 = vmatpush3.bf16.msra.mxu0 %v569_v59 }
  0x77   :  { %571 = vmatprep.subr.bf16.mxu0 %v726_v41 }
  0x7a   :  { %573 = vmatpush3.bf16.msra.mxu0 %v572_v62 }
 0x130   :  { %v199_v63 = vpop.f32.mrb[0].mxu0 }
 0x131   :  { %v432_v1 = vmul.f32 -1.442695, %v199_v63  ;;  %v201_v2 = vpop.f32.mrb[1].mxu0 }
 0x132   :  { %v433_v3 = vmul.f32 -1.442695, %v201_v2  ;;  %v270_v0 = vpop.f32.mrb[0].mxu1 }
 0x133   :  { %586 = vpow2.f32 %v432_v1  ;;  %v272_v4 = vpop.f32.mrb[1].mxu1 }
 0x134   :  { %588 = vpow2.f32 %v433_v3 }
 0x13d   :  { %v587_v5 = vpop.eup %586 }
 0x13e   :  { %v278_v6 = vadd.f32 1.0, %v587_v5  ;;  %v589_v7 = vpop.eup %588 }
 0x13f   :  { %v284_v8 = vadd.f32 1.0, %v589_v7 }
 0x140   :  { %590 = vrcp.f32 %v278_v6 }
 0x141   :  { %592 = vrcp.f32 %v284_v8 }
 0x14a   :  { %v591_v9 = vpop.eup %590 }
 0x14b   :  { %v287_v10 = vmul.f32 %v591_v9, %v272_v4  ;;  %v593_v12 = vpop.eup %592 }
 0x14c   :  { %v290_v14 = vsub.f32 1.0, %v593_v12  ;;  %v292_v18 = vmul.f32 %v593_v12, %v801_v24 }
 0x14d   :  { %v288_v11 = vadd.f32 %v287_v10, %v270_v0 }
 0x14f   :  { %594 = vtanh.f32 %v288_v11 }
 0x159   :  { %v595_v15 = vpop.eup %594 }
 0x15a   :  { %v291_v17 = vmul.f32 %v595_v15, %v290_v14 }
 0x15c   :  { %v293_v19 = vadd.f32 %v292_v18, %v291_v17 }
 0x15e   :  { %294 = vst [vmem:[#allocation2] sm:$0x1] %v293_v19  ;;  %v298_v20 = vmax.f32 %v293_v19, 0.0  ;;  %295 = vst [vmem:[#allocation9] sm:$0x1] %v293_v19 }
 0x160   :  { %v300_v21 = vsel %vm299_vm1, 1.0, %v298_v20 }
 0x161   :  { %484 = vmatmul.mubr.f32.vlgmr.msra.gmra.mrb[2].mxu0 %v300_v21 }
 0x234   :  { %v383_v22 = vpop.f32.mrb[2].mxu0 }
 0x235   :  { %v388_v23 = vsel %vm387_vm2, %v383_v22, -1e+30  ;;  %v485_v25 = vpop.f32.mrb[3].mxu0 }
 0x236   :  { %v390_v26 = vsel %vm389_vm3, %v388_v23, -inf }
 0x237   :  { %391 = vmax.xlane.f32.xlu0 %v390_v26 }
 0x2c4   :  { %v392_v27 = vpop.xlane.xlu0 %391 }
 0x2c5   :  { %v393_v28 = vsub.f32 %v388_v23, %v392_v27 }
 0x2c7   :  { %v394_v29 = vmul.f32 1.442695, %v393_v28 }
 0x2c9   :  { %596 = vpow2.f32 %v394_v29 }
 0x2d3   :  { %v597_v30 = vpop.eup %596 }
 0x2d4   :  { %v396_v24 = vsel %vm389_vm3, %v597_v30, 0.0 }
 0x2d5   :  { %397 = vadd.xlane.f32.xlu0 %v396_v24 }
 0x2d6   :  { %677 = shalt.err (!%p674_p0)
}
 0x2d7   :  { %s678_s13 = scalar_lea.hbm %s834_s4, 16 }
 0x2d8   :  { %p679_p1 = scmp.ne.s32.totalorder %s834_s4, %s678_s13  ;;  %p682_p2 = scmp.lt.u32.totalorder %s678_s13, %s834_s4 }
 0x2da   :  { %p684_p3 = pnand %p682_p2, %p679_p1 }
 0x2dc   :  { %687 = shalt.err (!%p684_p3)
}
 0x2dd   :  { %411 = dma.vmem_to_hbm [thread:$0]  %s409_s8, 16, %s834_s4, [#allocation5]  }
 0x2de   :  { %s729_s19 = smov [#allocation10]  }
 0x2df   :  { %s418_s20 = sshll.u32 %s729_s19, 4  ;;  %s419_s20 = int_to_ptr.vmem [resolvable:$true] %s418_s20 }
 0x2e0   :  { %s688_s21 = scalar_lea.vmem %s419_s20, 16  ;;  %s692_s22 = scalar_lea.vmem %s419_s20, 32 }
 0x2e1   :  { %p689_p4 = scmp.ne.s32.totalorder %s419_s20, %s688_s21  ;;  %p693_p5 = scmp.lt.s32.totalorder %s419_s20, %s419_s20 }
 0x2e2   :  { %p694_p6 = scmp.lt.s32.totalorder %s692_s22, %s688_s21 }
 0x2e4   :  { %p695_p7 = por %p694_p6, %p693_p5 }
 0x2e6   :  { %p696_p8 = pnand %p695_p7, %p689_p4 }
 0x362   :  { %v398_v31 = vpop.xlane.xlu0 %397 }
 0x363   :  { %598 = vrcp.f32 %v398_v31 }
 0x36d   :  { %v599_v32 = vpop.eup %598 }
 0x36e   :  { %v400_v33 = vmul.f32 %v599_v32, %v597_v30 }
 0x370   :  { %401 = vst [vmem:[#allocation10] sm:$0x1] %v400_v33 }
 0x371   :  { %699 = shalt.err (!%p696_p8)
}
 0x372   :  { %s700_s4 = scalar_lea.hbm %s835_s5, 16 }
 0x373   :  { %p701_p9 = scmp.ne.s32.totalorder %s835_s5, %s700_s4  ;;  %p704_p10 = scmp.lt.u32.totalorder %s700_s4, %s835_s5 }
 0x375   :  { %p706_p11 = pnand %p704_p10, %p701_p9 }
 0x377   :  { %709 = shalt.err (!%p706_p11)
}
 0x378   :  { %421 = dma.vmem_to_hbm [thread:$0]  %s419_s20, 16, %s835_s5, [#allocation11]  }
 0x379   :  { %714 = dma.done.wait [#allocation5], 16  }
 0x37a   :  { %715 = vsyncadd [#allocation5], 4294967280 }
 0x37b   :  { %716 = dma.done.wait [#allocation11], 16  }
 0x37c   :  { %717 = vsyncadd [#allocation11], 4294967280 }
 0x37d   :  { %428 = vsyncpa [#allocation4], 1 }
 0x37e   :  { %429 = vsyncpa [#allocation7], 1 }
 0x37f   :  { %430 = vsyncpa [#allocation5], 1 }
 0x380   :  { %431 = vsyncpa [#allocation11], 1 }

</bundles_post_ra>
